<compile_context>
chip_gen: v7x
topology: tpu7x:2x2x1
jax: 0.10.0
libtpu: 0.0.40
codegen_flags: <defaults>
</compile_context>

<pallas_src>
import functools

import jax
import jax.numpy as jnp
from jax.experimental import pallas as pl
from jax.experimental.pallas import tpu as pltpu


def _round_up(x, m):
    return ((x + m - 1) // m) * m


def _vmem_capacity_bytes():
    try:
        return int(pltpu.get_tpu_info().vmem_capacity_bytes)
    except Exception:
        return 64 * 1024 * 1024  # conservative fallback (v7x per-TensorCore VMEM)


def _feature_align(n):
    # v6e/v7x MXUs are 256x256: align large feature dims to 256 there; 128 elsewhere (v5e).
    if n < 256:
        return 128
    try:
        kind = jax.devices()[0].device_kind.lower()
    except Exception:
        return 128
    return 256 if ("v6" in kind or "v7" in kind) else 128


def _mlp_block_kernel(x_ref, w_ref, b_ref, scale_ref, shift_ref, *rest,
                      c_true, add_residual, use_x_res, pad_lanes):
    if use_x_res:
        xres_ref, o_ref, acc_ref = rest
    else:
        o_ref, acc_ref = rest

    k = pl.program_id(1)

    @pl.when(k == 0)
    def _():
        acc_ref[...] = jnp.zeros_like(acc_ref)

    # MXU matmul: bf16 operands straight from the input buffer, f32 accumulation in VMEM scratch.
    acc_ref[...] += jnp.dot(x_ref[...].astype(jnp.bfloat16), w_ref[...],
                            preferred_element_type=jnp.float32)

    @pl.when(k == pl.num_programs(1) - 1)
    def _():
        h = acc_ref[...] + b_ref[...]
        # LeakyReLU (negative_slope = 0.01, PyTorch default). Padded lanes stay exactly 0.
        h = jnp.where(h >= 0, h, 0.01 * h)

        # GroupNorm(1, C): two-pass per-row statistics over the TRUE channel count.
        inv_c = 1.0 / c_true
        mean = jnp.sum(h, axis=-1, keepdims=True) * inv_c
        centered = h - mean
        if pad_lanes:
            lane = jax.lax.broadcasted_iota(jnp.int32, h.shape, 1)
            centered = jnp.where(lane < c_true, centered, 0.0)
        var = jnp.sum(centered * centered, axis=-1, keepdims=True) * inv_c
        h = centered * jax.lax.rsqrt(var + 1e-5)

        # Affine + mask folded into scale/shift (padded lanes of scale/shift are 0).
        h = h * scale_ref[...] + shift_ref[...]

        if add_residual:
            res = xres_ref[...] if use_x_res else x_ref[...]
            h = h + res.astype(jnp.float32)

        o_ref[...] = h.astype(o_ref.dtype)


def prepare_mlp_params(w, b, gamma, beta, mask=None):
    """Pre-pad / pre-cast the MLPBlock parameters once, outside the per-step hot path.

    w is in PyTorch nn.Linear layout: (out_neurons, in_neurons).
    """
    out_n, in_n = w.shape
    in_pad = _round_up(in_n, _feature_align(in_n))
    out_pad = _round_up(out_n, _feature_align(out_n))

    # Decide resident weight vs. K-streamed slabs from the VMEM budget
    # (conservatively assume 2 pipeline buffers for the weight).
    cap = _vmem_capacity_bytes()
    w_budget = int(cap * 0.75) // 2
    if 4 * in_pad * out_pad <= w_budget:          # 2 bufs x bf16
        tk = in_pad                               # weight stays resident in VMEM
    else:
        k_align = _feature_align(in_n)
        tk = max(k_align, (w_budget // (4 * out_pad)) // k_align * k_align)
        tk = min(tk, in_pad)
        in_pad = _round_up(in_pad, tk)            # K slabs must tile the padded K dim exactly

    f32 = jnp.float32
    m = jnp.ones((out_n,), f32) if mask is None else mask.astype(f32)

    w_t = jnp.asarray(w).T.astype(jnp.bfloat16)   # (in, out) layout for the MXU
    if (in_pad, out_pad) == (in_n, out_n):
        w_p = w_t
    else:
        w_p = jnp.zeros((in_pad, out_pad), jnp.bfloat16).at[:in_n, :out_n].set(w_t)

    def _row(v):
        return jnp.zeros((1, out_pad), f32).at[0, :out_n].set(v.astype(f32))

    return dict(w=w_p, bias=_row(jnp.asarray(b)),
                scale=_row(jnp.asarray(gamma) * m), shift=_row(jnp.asarray(beta) * m),
                in_n=in_n, out_n=out_n, in_pad=in_pad, out_pad=out_pad, tk=tk)


def mlp_block_apply(x, params, residual=True):
    """x: (B, in_neurons) -> (B, out_neurons)."""
    B, in_n = x.shape
    assert in_n == params["in_n"], "x feature dim does not match the prepared weight"
    out_n, in_pad, out_pad, tk = (params["out_n"], params["in_pad"],
                                  params["out_pad"], params["tk"])
    if residual:
        assert in_n == out_n, "residual=True requires in_neurons == out_neurons"

    nk = in_pad // tk
    resident_w = nk == 1
    use_x_res = residual and not resident_w      # full-width x needed again for the residual

    cap = _vmem_capacity_bytes()
    budget = int(cap * 0.75)

    xi = jnp.dtype(x.dtype).itemsize
    w_buf_bytes = 4 * tk * out_pad               # bf16, assume 2 pipeline buffers (conservative)
    const_bytes = 3 * 4 * out_pad                # bias/scale/shift rows
    per_row = (2 * tk * xi                       # x block, double-buffered
               + (2 * out_pad * xi if use_x_res else 0)
               + 2 * out_pad * xi                # output block, double-buffered
               + 4 * out_pad)                    # f32 accumulator scratch
    avail = max(budget - w_buf_bytes - const_bytes, 8 * per_row)

    b_pad8 = _round_up(B, 8)
    tile_b = max(8, min(1024, (avail // per_row) // 8 * 8, b_pad8))
    # Keep >= 2 batch tiles when possible so the "parallel" axis can feed both v7x TensorCores.
    if tile_b == b_pad8 and b_pad8 >= 16 and b_pad8 % 16 == 0:
        tile_b = b_pad8 // 2
    b_pad = _round_up(B, tile_b)

    vmem_est = w_buf_bytes + const_bytes + tile_b * per_row
    vmem_limit = None
    if vmem_est > 12 * 1024 * 1024:
        vmem_limit = min(int(cap * 0.85), max(vmem_est + vmem_est // 4, 32 * 1024 * 1024))

    if (b_pad, in_pad) == (B, in_n):
        x_p = x                                   # no wrapper-side pad/copy
    else:
        x_p = jnp.zeros((b_pad, in_pad), x.dtype).at[:B, :in_n].set(x)

    kernel = functools.partial(
        _mlp_block_kernel, c_true=out_n, add_residual=residual,
        use_x_res=use_x_res, pad_lanes=(out_pad != out_n))

    def call(single_buffer_resident):
        res_mode = pl.Buffered(1) if single_buffer_resident else None
        in_specs = [
            pl.BlockSpec((tile_b, tk), lambda i, k: (i, k)),                 # x slab
            pl.BlockSpec((tk, out_pad), lambda i, k: (k, 0),
                         pipeline_mode=res_mode if resident_w else None),    # weight
            pl.BlockSpec((1, out_pad), lambda i, k: (0, 0), pipeline_mode=res_mode),  # bias
            pl.BlockSpec((1, out_pad), lambda i, k: (0, 0), pipeline_mode=res_mode),  # gamma*mask
            pl.BlockSpec((1, out_pad), lambda i, k: (0, 0), pipeline_mode=res_mode),  # beta*mask
        ]
        operands = [x_p, params["w"], params["bias"], params["scale"], params["shift"]]
        if use_x_res:
            in_specs.append(pl.BlockSpec((tile_b, out_pad), lambda i, k: (i, 0)))
            operands.append(x_p)
        return pl.pallas_call(
            kernel,
            out_shape=jax.ShapeDtypeStruct((b_pad, out_pad), x.dtype),
            grid=(b_pad // tile_b, nk),
            in_specs=in_specs,
            out_specs=pl.BlockSpec((tile_b, out_pad), lambda i, k: (i, 0)),
            scratch_shapes=[pltpu.VMEM((tile_b, out_pad), jnp.float32)],
            compiler_params=pltpu.CompilerParams(
                dimension_semantics=("parallel", "arbitrary"),
                vmem_limit_bytes=vmem_limit),
        )(*operands)

    try:
        out = call(True)       # single-buffer the constant-index operands
    except Exception:
        out = call(False)      # fall back to default double-buffering if Buffered(1) is rejected

    if (b_pad, out_pad) == (B, out_n):
        return out
    return out[:B, :out_n]


def mlp_block_forward(x, w, b, gamma, beta, mask=None, residual=True):
    """Convenience wrapper. w is in nn.Linear layout: (out_neurons, in_neurons)."""
    params = prepare_mlp_params(w, b, gamma, beta, mask)
    return mlp_block_apply(x, params, residual=residual)


if __name__ == "__main__":
    key = jax.random.PRNGKey(0)
    B, in_neurons, out_neurons = 8, 32, 32  # residual=True requires in == out

    k_x, k_w, k_b, k_g, k_be, k_m = jax.random.split(key, 6)
    x = jax.random.normal(k_x, (B, in_neurons), dtype=jnp.float32)
    w = jax.random.normal(k_w, (out_neurons, in_neurons), dtype=jnp.float32) * 0.1  # nn.Linear layout
    b = jax.random.normal(k_b, (out_neurons,), dtype=jnp.float32) * 0.1
    gamma = 1.0 + 0.1 * jax.random.normal(k_g, (out_neurons,), dtype=jnp.float32)
    beta = 0.1 * jax.random.normal(k_be, (out_neurons,), dtype=jnp.float32)
    mask = jax.random.bernoulli(k_m, p=0.7, shape=(out_neurons,)).astype(jnp.float32)

    out = mlp_block_forward(x, w, b, gamma, beta, mask, residual=True)
    jax.block_until_ready(out)

    # Plain-JAX reference of the PyTorch semantics (same bf16 matmul quantization).
    h_ref = jnp.dot(x.astype(jnp.bfloat16), w.T.astype(jnp.bfloat16),
                    preferred_element_type=jnp.float32) + b
    h_ref = jnp.where(h_ref >= 0, h_ref, 0.01 * h_ref)
    mu = h_ref.mean(axis=-1, keepdims=True)
    va = ((h_ref - mu) ** 2).mean(axis=-1, keepdims=True)
    h_ref = (h_ref - mu) * jax.lax.rsqrt(va + 1e-5)
    h_ref = h_ref * gamma + beta
    h_ref = h_ref * mask.reshape(1, -1) + x

    assert out.shape == (B, out_neurons)
    assert jnp.allclose(out, h_ref, atol=2e-3, rtol=2e-3), "mismatch vs reference"

    print("KERNEL_OK")
</pallas_src>

<mosaic_0001>
module attributes {stable_mosaic.version = 11 : i64} {
  func.func @_mlp_block_kernel(%arg0: i32, %arg1: i32, %arg2: memref<8x128xf32, #tpu.memory_space<vmem>>, %arg3: memref<128x128xbf16, #tpu.memory_space<vmem>>, %arg4: memref<1x128xf32, #tpu.memory_space<vmem>>, %arg5: memref<1x128xf32, #tpu.memory_space<vmem>>, %arg6: memref<1x128xf32, #tpu.memory_space<vmem>>, %arg7: memref<8x128xf32, #tpu.memory_space<vmem>>, %arg8: memref<8x128xf32, #tpu.memory_space<vmem>>) attributes {dimension_semantics = [#tpu.dimension_semantics<parallel>, #tpu.dimension_semantics<arbitrary>], iteration_bounds = array<i64: 1, 1>, scalar_prefetch = 0 : i64, scratch_operands = 1 : i64, tpu.core_type = #tpu.core_type<tc>, window_params = [{transform_indices = @transform_0, window_bounds = array<i64: 8, 128>}, {pipeline_mode = #tpu.pipeline_mode<synchronous>, transform_indices = @transform_1, window_bounds = array<i64: 128, 128>}, {pipeline_mode = #tpu.pipeline_mode<synchronous>, transform_indices = @transform_2, window_bounds = array<i64: 1, 128>}, {pipeline_mode = #tpu.pipeline_mode<synchronous>, transform_indices = @transform_3, window_bounds = array<i64: 1, 128>}, {pipeline_mode = #tpu.pipeline_mode<synchronous>, transform_indices = @transform_4, window_bounds = array<i64: 1, 128>}, {transform_indices = @transform_5, window_bounds = array<i64: 8, 128>}]} {
    %c0_i32 = arith.constant 0 : i32
    %0 = arith.cmpi eq, %arg1, %c0_i32 : i32
    %1 = arith.extui %0 : i1 to i32
    %c0_i32_0 = arith.constant 0 : i32
    %2 = arith.cmpi ne, %1, %c0_i32_0 : i32
    scf.if %2 {
      %cst_10 = arith.constant 0.000000e+00 : f32
      %13 = vector.broadcast %cst_10 : f32 to vector<8x128xf32>
      %c0_11 = arith.constant 0 : index
      %c0_12 = arith.constant 0 : index
      %14 = vector.load %arg8[%c0_11, %c0_12] : memref<8x128xf32, #tpu.memory_space<vmem>>, vector<8x128xf32>
      tpu.vector_store %arg8[%c0_11, %c0_12], %13 {strides = array<i32>} : memref<8x128xf32, #tpu.memory_space<vmem>>, vector<8x128xf32>,
    } else {
    }
    %c0 = arith.constant 0 : index
    %c0_1 = arith.constant 0 : index
    %3 = vector.load %arg8[%c0, %c0_1] : memref<8x128xf32, #tpu.memory_space<vmem>>, vector<8x128xf32>
    %c0_2 = arith.constant 0 : index
    %c0_3 = arith.constant 0 : index
    %4 = vector.load %arg2[%c0_2, %c0_3] : memref<8x128xf32, #tpu.memory_space<vmem>>, vector<8x128xf32>
    %5 = arith.truncf %4 : vector<8x128xf32> to vector<8x128xbf16>
    %c0_4 = arith.constant 0 : index
    %c0_5 = arith.constant 0 : index
    %6 = vector.load %arg3[%c0_4, %c0_5] : memref<128x128xbf16, #tpu.memory_space<vmem>>, vector<128x128xbf16>
    %cst = arith.constant dense<0.000000e+00> : vector<8x128xf32>
    %7 = tpu.matmul %5, %6, %cst {dimension_numbers = #tpu.dot_dimension_numbers<[1], [0], [0], [1], [0, 0, 1, 1], [], []>} : vector<8x128xbf16>, vector<128x128xbf16>, vector<8x128xf32> -> vector<8x128xf32>
    %8 = arith.addf %3, %7 : vector<8x128xf32>
    %c0_6 = arith.constant 0 : index
    %c0_7 = arith.constant 0 : index
    %9 = vector.load %arg8[%c0_6, %c0_7] : memref<8x128xf32, #tpu.memory_space<vmem>>, vector<8x128xf32>
    tpu.vector_store %arg8[%c0_6, %c0_7], %8 {strides = array<i32>} : memref<8x128xf32, #tpu.memory_space<vmem>>, vector<8x128xf32>,
    %c0_i32_8 = arith.constant 0 : i32
    %10 = arith.cmpi eq, %arg1, %c0_i32_8 : i32
    %11 = arith.extui %10 : i1 to i32
    %c0_i32_9 = arith.constant 0 : i32
    %12 = arith.cmpi ne, %11, %c0_i32_9 : i32
    scf.if %12 {
      %c0_10 = arith.constant 0 : index
      %c0_11 = arith.constant 0 : index
      %13 = vector.load %arg8[%c0_10, %c0_11] : memref<8x128xf32, #tpu.memory_space<vmem>>, vector<8x128xf32>
      %c0_12 = arith.constant 0 : index
      %c0_13 = arith.constant 0 : index
      %14 = vector.load %arg4[%c0_12, %c0_13] : memref<1x128xf32, #tpu.memory_space<vmem>>, vector<1x128xf32>
      %15 = vector.broadcast %14 : vector<1x128xf32> to vector<8x128xf32>
      %16 = arith.addf %13, %15 : vector<8x128xf32>
      %cst_14 = arith.constant 0.000000e+00 : f32
      %17 = vector.broadcast %cst_14 : f32 to vector<8x128xf32>
      %18 = arith.cmpf oge, %16, %17 : vector<8x128xf32>
      %cst_15 = arith.constant 0.00999999977 : f32
      %19 = vector.broadcast %cst_15 : f32 to vector<8x128xf32>
      %20 = arith.mulf %19, %16 : vector<8x128xf32>
      %21 = arith.select %18, %16, %20 : vector<8x128xi1>, vector<8x128xf32>
      %cst_16 = arith.constant dense<0.000000e+00> : vector<8xf32>
      %22 = vector.multi_reduction <add>, %21, %cst_16 [1] : vector<8x128xf32> to vector<8xf32>
      %23 = vector.shape_cast %22 : vector<8xf32> to vector<8x1xf32>
      %cst_17 = arith.constant 3.125000e-02 : f32
      %24 = vector.broadcast %cst_17 : f32 to vector<8x1xf32>
      %25 = arith.mulf %23, %24 : vector<8x1xf32>
      %26 = vector.broadcast %25 : vector<8x1xf32> to vector<8x128xf32>
      %27 = arith.subf %21, %26 : vector<8x128xf32>
      %28 = tpu.iota {dimensions = array<i32: 1>} : vector<8x128xi32>
      %c32_i32 = arith.constant 32 : i32
      %29 = vector.broadcast %c32_i32 : i32 to vector<8x128xi32>
      %30 = arith.cmpi slt, %28, %29 : vector<8x128xi32>
      %cst_18 = arith.constant 0.000000e+00 : f32
      %31 = vector.broadcast %cst_18 : f32 to vector<8x128xf32>
      %32 = arith.select %30, %27, %31 : vector<8x128xi1>, vector<8x128xf32>
      %33 = arith.mulf %32, %32 : vector<8x128xf32>
      %cst_19 = arith.constant dense<0.000000e+00> : vector<8xf32>
      %34 = vector.multi_reduction <add>, %33, %cst_19 [1] : vector<8x128xf32> to vector<8xf32>
      %35 = vector.shape_cast %34 : vector<8xf32> to vector<8x1xf32>
      %cst_20 = arith.constant 3.125000e-02 : f32
      %36 = vector.broadcast %cst_20 : f32 to vector<8x1xf32>
      %37 = arith.mulf %35, %36 : vector<8x1xf32>
      %cst_21 = arith.constant 9.99999974E-6 : f32
      %38 = vector.broadcast %cst_21 : f32 to vector<8x1xf32>
      %39 = arith.addf %37, %38 : vector<8x1xf32>
      %40 = math.rsqrt %39 : vector<8x1xf32>
      %41 = vector.broadcast %40 : vector<8x1xf32> to vector<8x128xf32>
      %42 = arith.mulf %32, %41 : vector<8x128xf32>
      %c0_22 = arith.constant 0 : index
      %c0_23 = arith.constant 0 : index
      %43 = vector.load %arg5[%c0_22, %c0_23] : memref<1x128xf32, #tpu.memory_space<vmem>>, vector<1x128xf32>
      %44 = vector.broadcast %43 : vector<1x128xf32> to vector<8x128xf32>
      %45 = arith.mulf %42, %44 : vector<8x128xf32>
      %c0_24 = arith.constant 0 : index
      %c0_25 = arith.constant 0 : index
      %46 = vector.load %arg6[%c0_24, %c0_25] : memref<1x128xf32, #tpu.memory_space<vmem>>, vector<1x128xf32>
      %47 = vector.broadcast %46 : vector<1x128xf32> to vector<8x128xf32>
      %48 = arith.addf %45, %47 : vector<8x128xf32>
      %c0_26 = arith.constant 0 : index
      %c0_27 = arith.constant 0 : index
      %49 = vector.load %arg2[%c0_26, %c0_27] : memref<8x128xf32, #tpu.memory_space<vmem>>, vector<8x128xf32>
      %50 = arith.addf %48, %49 : vector<8x128xf32>
      %c0_28 = arith.constant 0 : index
      %c0_29 = arith.constant 0 : index
      %51 = vector.load %arg7[%c0_28, %c0_29] : memref<8x128xf32, #tpu.memory_space<vmem>>, vector<8x128xf32>
      tpu.vector_store %arg7[%c0_28, %c0_29], %50 {strides = array<i32>} : memref<8x128xf32, #tpu.memory_space<vmem>>, vector<8x128xf32>,
    } else {
    }
    return
  }
  func.func @transform_0(%arg0: i32, %arg1: i32) -> (i32, i32) {
    %c0_i32 = arith.constant 0 : i32
    return %arg0, %arg1 : i32, i32
  }
  func.func @transform_1(%arg0: i32, %arg1: i32) -> (i32, i32) {
    %c0_i32 = arith.constant 0 : i32
    %c0_i32_0 = arith.constant 0 : i32
    return %arg1, %c0_i32 : i32, i32
  }
  func.func @transform_2(%arg0: i32, %arg1: i32) -> (i32, i32) {
    %c0_i32 = arith.constant 0 : i32
    %c0_i32_0 = arith.constant 0 : i32
    %c0_i32_1 = arith.constant 0 : i32
    return %c0_i32, %c0_i32_0 : i32, i32
  }
  func.func @transform_3(%arg0: i32, %arg1: i32) -> (i32, i32) {
    %c0_i32 = arith.constant 0 : i32
    %c0_i32_0 = arith.constant 0 : i32
    %c0_i32_1 = arith.constant 0 : i32
    return %c0_i32, %c0_i32_0 : i32, i32
  }
  func.func @transform_4(%arg0: i32, %arg1: i32) -> (i32, i32) {
    %c0_i32 = arith.constant 0 : i32
    %c0_i32_0 = arith.constant 0 : i32
    %c0_i32_1 = arith.constant 0 : i32
    return %c0_i32, %c0_i32_0 : i32, i32
  }
  func.func @transform_5(%arg0: i32, %arg1: i32) -> (i32, i32) {
    %c0_i32 = arith.constant 0 : i32
    %c0_i32_0 = arith.constant 0 : i32
    return %arg0, %c0_i32 : i32, i32
  }
}

module attributes {stable_mosaic.version = 11 : i64} {
  func.func @_mlp_block_kernel(%arg0: i32, %arg1: i32, %arg2: memref<8x128xf32, #tpu.memory_space<vmem>>, %arg3: memref<128x128xbf16, #tpu.memory_space<vmem>>, %arg4: memref<1x128xf32, #tpu.memory_space<vmem>>, %arg5: memref<1x128xf32, #tpu.memory_space<vmem>>, %arg6: memref<1x128xf32, #tpu.memory_space<vmem>>, %arg7: memref<8x128xf32, #tpu.memory_space<vmem>>, %arg8: memref<8x128xf32, #tpu.memory_space<vmem>>) attributes {dimension_semantics = [#tpu.dimension_semantics<parallel>, #tpu.dimension_semantics<arbitrary>], iteration_bounds = array<i64: 1, 1>, scalar_prefetch = 0 : i64, scratch_operands = 1 : i64, tpu.core_type = #tpu.core_type<tc>, window_params = [{transform_indices = @transform_0, window_bounds = array<i64: 8, 128>}, {transform_indices = @transform_1, window_bounds = array<i64: 128, 128>}, {pipeline_mode = #tpu.pipeline_mode<synchronous>, transform_indices = @transform_2, window_bounds = array<i64: 1, 128>}, {pipeline_mode = #tpu.pipeline_mode<synchronous>, transform_indices = @transform_3, window_bounds = array<i64: 1, 128>}, {pipeline_mode = #tpu.pipeline_mode<synchronous>, transform_indices = @transform_4, window_bounds = array<i64: 1, 128>}, {transform_indices = @transform_5, window_bounds = array<i64: 8, 128>}]} {
    %c0_i32 = arith.constant 0 : i32
    %0 = arith.cmpi eq, %arg1, %c0_i32 : i32
    %1 = arith.extui %0 : i1 to i32
    %c0_i32_0 = arith.constant 0 : i32
    %2 = arith.cmpi ne, %1, %c0_i32_0 : i32
    scf.if %2 {
      %cst_10 = arith.constant 0.000000e+00 : f32
      %13 = vector.broadcast %cst_10 : f32 to vector<8x128xf32>
      %c0_11 = arith.constant 0 : index
      %c0_12 = arith.constant 0 : index
      %14 = vector.load %arg8[%c0_11, %c0_12] : memref<8x128xf32, #tpu.memory_space<vmem>>, vector<8x128xf32>
      tpu.vector_store %arg8[%c0_11, %c0_12], %13 {strides = array<i32>} : memref<8x128xf32, #tpu.memory_space<vmem>>, vector<8x128xf32>,
    } else {
    }
    %c0 = arith.constant 0 : index
    %c0_1 = arith.constant 0 : index
    %3 = vector.load %arg8[%c0, %c0_1] : memref<8x128xf32, #tpu.memory_space<vmem>>, vector<8x128xf32>
    %c0_2 = arith.constant 0 : index
    %c0_3 = arith.constant 0 : index
    %4 = vector.load %arg2[%c0_2, %c0_3] : memref<8x128xf32, #tpu.memory_space<vmem>>, vector<8x128xf32>
    %5 = arith.truncf %4 : vector<8x128xf32> to vector<8x128xbf16>
    %c0_4 = arith.constant 0 : index
    %c0_5 = arith.constant 0 : index
    %6 = vector.load %arg3[%c0_4, %c0_5] : memref<128x128xbf16, #tpu.memory_space<vmem>>, vector<128x128xbf16>
    %cst = arith.constant dense<0.000000e+00> : vector<8x128xf32>
    %7 = tpu.matmul %5, %6, %cst {dimension_numbers = #tpu.dot_dimension_numbers<[1], [0], [0], [1], [0, 0, 1, 1], [], []>} : vector<8x128xbf16>, vector<128x128xbf16>, vector<8x128xf32> -> vector<8x128xf32>
    %8 = arith.addf %3, %7 : vector<8x128xf32>
    %c0_6 = arith.constant 0 : index
    %c0_7 = arith.constant 0 : index
    %9 = vector.load %arg8[%c0_6, %c0_7] : memref<8x128xf32, #tpu.memory_space<vmem>>, vector<8x128xf32>
    tpu.vector_store %arg8[%c0_6, %c0_7], %8 {strides = array<i32>} : memref<8x128xf32, #tpu.memory_space<vmem>>, vector<8x128xf32>,
    %c0_i32_8 = arith.constant 0 : i32
    %10 = arith.cmpi eq, %arg1, %c0_i32_8 : i32
    %11 = arith.extui %10 : i1 to i32
    %c0_i32_9 = arith.constant 0 : i32
    %12 = arith.cmpi ne, %11, %c0_i32_9 : i32
    scf.if %12 {
      %c0_10 = arith.constant 0 : index
      %c0_11 = arith.constant 0 : index
      %13 = vector.load %arg8[%c0_10, %c0_11] : memref<8x128xf32, #tpu.memory_space<vmem>>, vector<8x128xf32>
      %c0_12 = arith.constant 0 : index
      %c0_13 = arith.constant 0 : index
      %14 = vector.load %arg4[%c0_12, %c0_13] : memref<1x128xf32, #tpu.memory_space<vmem>>, vector<1x128xf32>
      %15 = vector.broadcast %14 : vector<1x128xf32> to vector<8x128xf32>
      %16 = arith.addf %13, %15 : vector<8x128xf32>
      %cst_14 = arith.constant 0.000000e+00 : f32
      %17 = vector.broadcast %cst_14 : f32 to vector<8x128xf32>
      %18 = arith.cmpf oge, %16, %17 : vector<8x128xf32>
      %cst_15 = arith.constant 0.00999999977 : f32
      %19 = vector.broadcast %cst_15 : f32 to vector<8x128xf32>
      %20 = arith.mulf %19, %16 : vector<8x128xf32>
      %21 = arith.select %18, %16, %20 : vector<8x128xi1>, vector<8x128xf32>
      %cst_16 = arith.constant dense<0.000000e+00> : vector<8xf32>
      %22 = vector.multi_reduction <add>, %21, %cst_16 [1] : vector<8x128xf32> to vector<8xf32>
      %23 = vector.shape_cast %22 : vector<8xf32> to vector<8x1xf32>
      %cst_17 = arith.constant 3.125000e-02 : f32
      %24 = vector.broadcast %cst_17 : f32 to vector<8x1xf32>
      %25 = arith.mulf %23, %24 : vector<8x1xf32>
      %26 = vector.broadcast %25 : vector<8x1xf32> to vector<8x128xf32>
      %27 = arith.subf %21, %26 : vector<8x128xf32>
      %28 = tpu.iota {dimensions = array<i32: 1>} : vector<8x128xi32>
      %c32_i32 = arith.constant 32 : i32
      %29 = vector.broadcast %c32_i32 : i32 to vector<8x128xi32>
      %30 = arith.cmpi slt, %28, %29 : vector<8x128xi32>
      %cst_18 = arith.constant 0.000000e+00 : f32
      %31 = vector.broadcast %cst_18 : f32 to vector<8x128xf32>
      %32 = arith.select %30, %27, %31 : vector<8x128xi1>, vector<8x128xf32>
      %33 = arith.mulf %32, %32 : vector<8x128xf32>
      %cst_19 = arith.constant dense<0.000000e+00> : vector<8xf32>
      %34 = vector.multi_reduction <add>, %33, %cst_19 [1] : vector<8x128xf32> to vector<8xf32>
      %35 = vector.shape_cast %34 : vector<8xf32> to vector<8x1xf32>
      %cst_20 = arith.constant 3.125000e-02 : f32
      %36 = vector.broadcast %cst_20 : f32 to vector<8x1xf32>
      %37 = arith.mulf %35, %36 : vector<8x1xf32>
      %cst_21 = arith.constant 9.99999974E-6 : f32
      %38 = vector.broadcast %cst_21 : f32 to vector<8x1xf32>
      %39 = arith.addf %37, %38 : vector<8x1xf32>
      %40 = math.rsqrt %39 : vector<8x1xf32>
      %41 = vector.broadcast %40 : vector<8x1xf32> to vector<8x128xf32>
      %42 = arith.mulf %32, %41 : vector<8x128xf32>
      %c0_22 = arith.constant 0 : index
      %c0_23 = arith.constant 0 : index
      %43 = vector.load %arg5[%c0_22, %c0_23] : memref<1x128xf32, #tpu.memory_space<vmem>>, vector<1x128xf32>
      %44 = vector.broadcast %43 : vector<1x128xf32> to vector<8x128xf32>
      %45 = arith.mulf %42, %44 : vector<8x128xf32>
      %c0_24 = arith.constant 0 : index
      %c0_25 = arith.constant 0 : index
      %46 = vector.load %arg6[%c0_24, %c0_25] : memref<1x128xf32, #tpu.memory_space<vmem>>, vector<1x128xf32>
      %47 = vector.broadcast %46 : vector<1x128xf32> to vector<8x128xf32>
      %48 = arith.addf %45, %47 : vector<8x128xf32>
      %c0_26 = arith.constant 0 : index
      %c0_27 = arith.constant 0 : index
      %49 = vector.load %arg2[%c0_26, %c0_27] : memref<8x128xf32, #tpu.memory_space<vmem>>, vector<8x128xf32>
      %50 = arith.addf %48, %49 : vector<8x128xf32>
      %c0_28 = arith.constant 0 : index
      %c0_29 = arith.constant 0 : index
      %51 = vector.load %arg7[%c0_28, %c0_29] : memref<8x128xf32, #tpu.memory_space<vmem>>, vector<8x128xf32>
      tpu.vector_store %arg7[%c0_28, %c0_29], %50 {strides = array<i32>} : memref<8x128xf32, #tpu.memory_space<vmem>>, vector<8x128xf32>,
    } else {
    }
    return
  }
  func.func @transform_0(%arg0: i32, %arg1: i32) -> (i32, i32) {
    %c0_i32 = arith.constant 0 : i32
    return %arg0, %arg1 : i32, i32
  }
  func.func @transform_1(%arg0: i32, %arg1: i32) -> (i32, i32) {
    %c0_i32 = arith.constant 0 : i32
    %c0_i32_0 = arith.constant 0 : i32
    return %arg1, %c0_i32 : i32, i32
  }
  func.func @transform_2(%arg0: i32, %arg1: i32) -> (i32, i32) {
    %c0_i32 = arith.constant 0 : i32
    %c0_i32_0 = arith.constant 0 : i32
    %c0_i32_1 = arith.constant 0 : i32
    return %c0_i32, %c0_i32_0 : i32, i32
  }
  func.func @transform_3(%arg0: i32, %arg1: i32) -> (i32, i32) {
    %c0_i32 = arith.constant 0 : i32
    %c0_i32_0 = arith.constant 0 : i32
    %c0_i32_1 = arith.constant 0 : i32
    return %c0_i32, %c0_i32_0 : i32, i32
  }
  func.func @transform_4(%arg0: i32, %arg1: i32) -> (i32, i32) {
    %c0_i32 = arith.constant 0 : i32
    %c0_i32_0 = arith.constant 0 : i32
    %c0_i32_1 = arith.constant 0 : i32
    return %c0_i32, %c0_i32_0 : i32, i32
  }
  func.func @transform_5(%arg0: i32, %arg1: i32) -> (i32, i32) {
    %c0_i32 = arith.constant 0 : i32
    %c0_i32_0 = arith.constant 0 : i32
    return %arg0, %c0_i32 : i32, i32
  }
}

</mosaic_0001>

<bundles_post_ra>
// kernel: tpu_custom_call.1
= control target key start
LH: loop header
LB: loop body
LE: loop exit
PB: predicated region body
PF: predicated region fallthrough
CT: control target
= control target key end

     0   :  { %10 = vsyncpa [#allocation4], 0  ;;  %s445_s0 = inlined_call_operand.hbm [shape: f32[8,128], index: 0, kind: input, shape index: {}]   ;;  %s446_s1 = inlined_call_operand.hbm [shape: bf16[128,128], index: 1, kind: input, shape index: {}]   ;;  %s447_s2 = inlined_call_operand.vmem [shape: f32[1,128], index: 2, kind: input, shape index: {}]   ;;  %s448_s3 = inlined_call_operand.vmem [shape: f32[1,128], index: 3, kind: input, shape index: {}]   ;;  %s449_s4 = inlined_call_operand.vmem [shape: f32[1,128], index: 4, kind: input, shape index: {}]   ;;  %s450_s5 = inlined_call_operand.hbm [shape: f32[8,128], index: 5, kind: output, shape index: {}]  }
   0x1   :  { %11 = vsyncpa [#allocation7], 0 }
   0x2   :  { %12 = vsyncpa [#allocation5], 0  ;;  %s356_s18 = smov [#allocation3]   ;;  %s357_s20 = smov [#allocation6]  }
   0x3   :  { %s19_s19 = sshll.u32 %s356_s18, 4  ;;  %s28_s21 = sshll.u32 %s357_s20, 4  ;;  %s20_s19 = int_to_ptr.vmem [resolvable:$true] %s19_s19  ;;  %s393_s21 = int_to_ptr.vmem [resolvable:$true] %s28_s21 }
   0x4   :  { %s284_s24 = scalar_lea.hbm %s445_s0, 128 }
   0x5   :  { %p285_p0 = scmp.ne.s32.totalorder %s445_s0, %s284_s24  ;;  %p288_p1 = scmp.lt.u32.totalorder %s284_s24, %s445_s0 }
   0x7   :  { %p290_p2 = pnand %p288_p1, %p285_p0 }
   0x9   :  { %293 = shalt.err (!%p290_p2)
}
   0xa   :  { %s294_s29 = scalar_lea.vmem %s20_s19, 128  ;;  %p299_p4 = scmp.lt.s32.totalorder %s20_s19, %s20_s19 }
   0xb   :  { %p295_p3 = scmp.ne.s32.totalorder %s20_s19, %s294_s29  ;;  %p300_p5 = scmp.lt.s32.totalorder %s294_s29, %s294_s29 }
   0xd   :  { %p301_p6 = por %p300_p5, %p299_p4 }
   0xf   :  { %p302_p7 = pnand %p301_p6, %p295_p3 }
  0x11   :  { %305 = shalt.err (!%p302_p7)
}
  0x12   :  { %22 = dma.hbm_to_vmem [thread:$0]  %s445_s0, 128, %s20_s19, [#allocation4]  }
  0x13   :  { %s306_s9 = scalar_lea.hbm %s446_s1, 1024 }
  0x14   :  { %p307_p8 = scmp.ne.s32.totalorder %s446_s1, %s306_s9  ;;  %p310_p9 = scmp.lt.u32.totalorder %s306_s9, %s446_s1 }
  0x16   :  { %p312_p10 = pnand %p310_p9, %p307_p8 }
  0x18   :  { %315 = shalt.err (!%p312_p10)
}
  0x19   :  { %s316_s14 = scalar_lea.vmem %s393_s21, 1024  ;;  %p321_p12 = scmp.lt.s32.totalorder %s393_s21, %s393_s21 }
  0x1a   :  { %p317_p11 = scmp.ne.s32.totalorder %s393_s21, %s316_s14  ;;  %p322_p13 = scmp.lt.s32.totalorder %s316_s14, %s316_s14 }
  0x1c   :  { %p323_p0 = por %p322_p13, %p321_p12 }
  0x1e   :  { %p324_p1 = pnand %p323_p0, %p317_p11 }
  0x20   :  { %327 = shalt.err (!%p324_p1)
}
  0x21   :  { %s358_s0 = smov 64   ;;  %s359_s15 = smov 4  }
  0x22   :  { %34 = dma.hbm_to_vmem [thread:$0]  %s446_s1, 1024, %s393_s21, [#allocation7], %s358_s0, %s358_s0, %s359_s15  }
  0x23   :  { %350 = dma.done.wait [#allocation4], 128  }
  0x24   :  { %351 = vsyncadd [#allocation4], 4294967168 }
  0x25   :  { %352 = dma.done.wait [#allocation7], 1024  }
  0x26   :  { %353 = vsyncadd [#allocation7], 4294966272  ;;  %v360_v0 = vmov 0.0   ;;  %vm361_vm0 = vmmov 0   ;;  %v274_v1 = vld [vmem:[#allocation6] sm:$0xff]   ;;  %v275_v2 = vld [vmem:[#allocation6 + $0x8] sm:$0xff]   ;;  %v181_v19 = vlaneseq }
  0x27   :  { %247 = vmatprep.subr.bf16.mxu0 %v360_v0  ;;  %263 = vmatprep.mubr.msk.bf16.mxu0 %vm361_vm0, %v360_v0  ;;  %v276_v3 = vld [vmem:[#allocation6 + $0x10] sm:$0xff]   ;;  %v277_v4 = vld [vmem:[#allocation6 + $0x18] sm:$0xff]   ;;  %v278_v5 = vld [vmem:[#allocation6 + $0x20] sm:$0xff]   ;;  %s362_s22 = smov [#allocation8]  }
  0x28   :  { %248 = vmatpush3.bf16.msra.mxu0 %v274_v1  ;;  %v279_v6 = vld [vmem:[#allocation6 + $0x28] sm:$0xff]   ;;  %v280_v7 = vld [vmem:[#allocation6 + $0x30] sm:$0xff]   ;;  %v281_v8 = vld [vmem:[#allocation6 + $0x38] sm:$0xff]   ;;  %v182_v20 = vand.u32 127, %v181_v19  ;;  %s217_s23 = sshll.u32 %s362_s22, 4  ;;  %s218_s23 = int_to_ptr.vmem [resolvable:$true] %s217_s23 }
  0x29   :  { %249 = vmatprep.subr.bf16.mxu0 %v360_v0  ;;  %v54_v9 = vld [vmem:[#allocation3] sm:$0xff]  ;;  %s328_s24 = scalar_lea.vmem %s218_s23, 128  ;;  %p333_p3 = scmp.lt.s32.totalorder %s218_s23, %s218_s23 }
  0x2a   :  { %v55_v10 = vpack.c.bf16 %v54_v9, %v54_v9  ;;  %v235_v11 = vld [vmem:[%s447_s2] ss:$0 sm:$0xff]  ;;  %vm183_vm2 = vcmp.lt.s32.totalorder %v182_v20, 32  ;;  %p329_p2 = scmp.ne.s32.totalorder %s218_s23, %s328_s24  ;;  %p334_p4 = scmp.lt.s32.totalorder %s328_s24, %s328_s24 }
  0x2b   :  { %v236_v30 = vld [vmem:[%s448_s3] ss:$0 sm:$0xff] }
  0x2c   :  { %250 = vmatpush3.bf16.msra.mxu0 %v275_v2  ;;  %v237_v32 = vld [vmem:[%s449_s4] ss:$0 sm:$0xff]  ;;  %p335_p5 = por %p334_p4, %p333_p3 }
  0x2d   :  { %251 = vmatprep.subr.bf16.mxu0 %v360_v0 }
  0x2e   :  { %p336_p6 = pnand %p335_p5, %p329_p2 }
  0x30   :  { %252 = vmatpush3.bf16.msra.mxu0 %v276_v3 }
  0x31   :  { %253 = vmatprep.subr.bf16.mxu0 %v360_v0 }
  0x34   :  { %254 = vmatpush3.bf16.msra.mxu0 %v277_v4 }
  0x35   :  { %255 = vmatprep.subr.bf16.mxu0 %v360_v0 }
  0x38   :  { %256 = vmatpush3.bf16.msra.mxu0 %v278_v5 }
  0x39   :  { %257 = vmatprep.subr.bf16.mxu0 %v360_v0 }
  0x3c   :  { %258 = vmatpush3.bf16.msra.mxu0 %v279_v6 }
  0x3d   :  { %259 = vmatprep.subr.bf16.mxu0 %v360_v0 }
  0x40   :  { %260 = vmatpush3.bf16.msra.mxu0 %v280_v7 }
  0x41   :  { %261 = vmatprep.subr.bf16.mxu0 %v360_v0 }
  0x44   :  { %262 = vmatpush3.bf16.msra.mxu0 %v281_v8 }
  0x47   :  { %264 = vmatmul.mubr.bf16.vlgmr.msra.gmra.mrb[0].mxu0 %v55_v10 }
 0x11a   :  { %v154_v12 = vpop.f32.mrb[0].mxu0 }
 0x11b   :  { %v173_v13 = vadd.f32 %v235_v11, %v154_v12  ;;  %v265_v14 = vpop.f32.mrb[1].mxu0 }
 0x11c   :  { %v157_v15 = vpop.f32.mrb[2].mxu0 }
 0x11d   :  { %v266_v16 = vpop.f32.mrb[3].mxu0  ;;  %vm174_vm1 = vcmp.ge.f32.partialorder %v173_v13, 0.0  ;;  %v175_v17 = vmul.f32 0.01, %v173_v13 }
 0x11f   :  { %v176_v18 = vsel %vm174_vm1, %v173_v13, %v175_v17 }
 0x120   :  { %177 = vadd.xlane.f32.xlu0 %v176_v18 }
 0x1ad   :  { %v178_v21 = vpop.xlane.xlu0 %177 }
 0x1ae   :  { %v179_v22 = vmul.f32 0.03125, %v178_v21 }
 0x1b0   :  { %v180_v23 = vsub.f32 %v176_v18, %v179_v22 }
 0x1b2   :  { %v184_v24 = vsel %vm183_vm2, %v180_v23, 0.0 }
 0x1b3   :  { %v185_v25 = vmul.f32 %v184_v24, %v184_v24 }
 0x1b5   :  { %186 = vadd.xlane.f32.xlu0 %v185_v25 }
 0x242   :  { %v187_v26 = vpop.xlane.xlu0 %186 }
 0x243   :  { %v188_v27 = vmul.f32 0.03125, %v187_v26 }
 0x245   :  { %v189_v28 = vadd.f32 1e-05, %v188_v27 }
 0x247   :  { %282 = vrsqrt.f32 %v189_v28 }
 0x251   :  { %v283_v29 = vpop.eup %282 }
 0x252   :  { %v191_v31 = vmul.f32 %v283_v29, %v184_v24 }
 0x254   :  { %v199_v33 = vmul.f32 %v236_v30, %v191_v31 }
 0x256   :  { %v207_v34 = vadd.f32 %v237_v32, %v199_v33 }
 0x258   :  { %v209_v35 = vadd.f32 %v207_v34, %v54_v9 }
 0x25a   :  { %210 = vst [vmem:[#allocation8] sm:$0xff] %v209_v35 }
 0x25b   :  { %339 = shalt.err (!%p336_p6)
}
 0x25c   :  { %s340_s26 = scalar_lea.hbm %s450_s5, 128 }
 0x25d   :  { %p341_p7 = scmp.ne.s32.totalorder %s450_s5, %s340_s26  ;;  %p344_p8 = scmp.lt.u32.totalorder %s340_s26, %s450_s5 }
 0x25f   :  { %p346_p9 = pnand %p344_p8, %p341_p7 }
 0x261   :  { %349 = shalt.err (!%p346_p9)
}
 0x262   :  { %220 = dma.vmem_to_hbm [thread:$0]  %s218_s23, 128, %s450_s5, [#allocation5]  }
 0x263   :  { %354 = dma.done.wait [#allocation5], 128  }
 0x264   :  { %355 = vsyncadd [#allocation5], 4294967168 }
 0x265   :  { %224 = vsyncpa [#allocation4], 1 }
 0x266   :  { %225 = vsyncpa [#allocation7], 1 }
 0x267   :  { %226 = vsyncpa [#allocation5], 1 }

// kernel: tpu_custom_call.1
= control target key start
LH: loop header
LB: loop body
LE: loop exit
PB: predicated region body
PF: predicated region fallthrough
CT: control target
= control target key end

     0   :  { %10 = vsyncpa [#allocation4], 0  ;;  %s445_s0 = inlined_call_operand.hbm [shape: f32[8,128], index: 0, kind: input, shape index: {}]   ;;  %s446_s1 = inlined_call_operand.hbm [shape: bf16[128,128], index: 1, kind: input, shape index: {}]   ;;  %s447_s2 = inlined_call_operand.vmem [shape: f32[1,128], index: 2, kind: input, shape index: {}]   ;;  %s448_s3 = inlined_call_operand.vmem [shape: f32[1,128], index: 3, kind: input, shape index: {}]   ;;  %s449_s4 = inlined_call_operand.vmem [shape: f32[1,128], index: 4, kind: input, shape index: {}]   ;;  %s450_s5 = inlined_call_operand.hbm [shape: f32[8,128], index: 5, kind: output, shape index: {}]  }
   0x1   :  { %11 = vsyncpa [#allocation7], 0 }
   0x2   :  { %12 = vsyncpa [#allocation5], 0  ;;  %s356_s18 = smov [#allocation3]   ;;  %s357_s20 = smov [#allocation6]  }
   0x3   :  { %s19_s19 = sshll.u32 %s356_s18, 4  ;;  %s28_s21 = sshll.u32 %s357_s20, 4  ;;  %s20_s19 = int_to_ptr.vmem [resolvable:$true] %s19_s19  ;;  %s393_s21 = int_to_ptr.vmem [resolvable:$true] %s28_s21 }
   0x4   :  { %s284_s24 = scalar_lea.hbm %s445_s0, 128 }
   0x5   :  { %p285_p0 = scmp.ne.s32.totalorder %s445_s0, %s284_s24  ;;  %p288_p1 = scmp.lt.u32.totalorder %s284_s24, %s445_s0 }
   0x7   :  { %p290_p2 = pnand %p288_p1, %p285_p0 }
   0x9   :  { %293 = shalt.err (!%p290_p2)
}
   0xa   :  { %s294_s29 = scalar_lea.vmem %s20_s19, 128  ;;  %p299_p4 = scmp.lt.s32.totalorder %s20_s19, %s20_s19 }
   0xb   :  { %p295_p3 = scmp.ne.s32.totalorder %s20_s19, %s294_s29  ;;  %p300_p5 = scmp.lt.s32.totalorder %s294_s29, %s294_s29 }
   0xd   :  { %p301_p6 = por %p300_p5, %p299_p4 }
   0xf   :  { %p302_p7 = pnand %p301_p6, %p295_p3 }
  0x11   :  { %305 = shalt.err (!%p302_p7)
}
  0x12   :  { %22 = dma.hbm_to_vmem [thread:$0]  %s445_s0, 128, %s20_s19, [#allocation4]  }
  0x13   :  { %s306_s9 = scalar_lea.hbm %s446_s1, 1024 }
  0x14   :  { %p307_p8 = scmp.ne.s32.totalorder %s446_s1, %s306_s9  ;;  %p310_p9 = scmp.lt.u32.totalorder %s306_s9, %s446_s1 }
  0x16   :  { %p312_p10 = pnand %p310_p9, %p307_p8 }
  0x18   :  { %315 = shalt.err (!%p312_p10)
}
  0x19   :  { %s316_s14 = scalar_lea.vmem %s393_s21, 1024  ;;  %p321_p12 = scmp.lt.s32.totalorder %s393_s21, %s393_s21 }
  0x1a   :  { %p317_p11 = scmp.ne.s32.totalorder %s393_s21, %s316_s14  ;;  %p322_p13 = scmp.lt.s32.totalorder %s316_s14, %s316_s14 }
  0x1c   :  { %p323_p0 = por %p322_p13, %p321_p12 }
  0x1e   :  { %p324_p1 = pnand %p323_p0, %p317_p11 }
  0x20   :  { %327 = shalt.err (!%p324_p1)
}
  0x21   :  { %s358_s0 = smov 64   ;;  %s359_s15 = smov 4  }
  0x22   :  { %34 = dma.hbm_to_vmem [thread:$0]  %s446_s1, 1024, %s393_s21, [#allocation7], %s358_s0, %s358_s0, %s359_s15  }
  0x23   :  { %350 = dma.done.wait [#allocation4], 128  }
  0x24   :  { %351 = vsyncadd [#allocation4], 4294967168 }
  0x25   :  { %352 = dma.done.wait [#allocation7], 1024  }
  0x26   :  { %353 = vsyncadd [#allocation7], 4294966272  ;;  %v360_v0 = vmov 0.0   ;;  %vm361_vm0 = vmmov 0   ;;  %v274_v1 = vld [vmem:[#allocation6] sm:$0xff]   ;;  %v275_v2 = vld [vmem:[#allocation6 + $0x8] sm:$0xff]   ;;  %v181_v19 = vlaneseq }
  0x27   :  { %247 = vmatprep.subr.bf16.mxu0 %v360_v0  ;;  %263 = vmatprep.mubr.msk.bf16.mxu0 %vm361_vm0, %v360_v0  ;;  %v276_v3 = vld [vmem:[#allocation6 + $0x10] sm:$0xff]   ;;  %v277_v4 = vld [vmem:[#allocation6 + $0x18] sm:$0xff]   ;;  %v278_v5 = vld [vmem:[#allocation6 + $0x20] sm:$0xff]   ;;  %s362_s22 = smov [#allocation8]  }
  0x28   :  { %248 = vmatpush3.bf16.msra.mxu0 %v274_v1  ;;  %v279_v6 = vld [vmem:[#allocation6 + $0x28] sm:$0xff]   ;;  %v280_v7 = vld [vmem:[#allocation6 + $0x30] sm:$0xff]   ;;  %v281_v8 = vld [vmem:[#allocation6 + $0x38] sm:$0xff]   ;;  %v182_v20 = vand.u32 127, %v181_v19  ;;  %s217_s23 = sshll.u32 %s362_s22, 4  ;;  %s218_s23 = int_to_ptr.vmem [resolvable:$true] %s217_s23 }
  0x29   :  { %249 = vmatprep.subr.bf16.mxu0 %v360_v0  ;;  %v54_v9 = vld [vmem:[#allocation3] sm:$0xff]  ;;  %s328_s24 = scalar_lea.vmem %s218_s23, 128  ;;  %p333_p3 = scmp.lt.s32.totalorder %s218_s23, %s218_s23 }
  0x2a   :  { %v55_v10 = vpack.c.bf16 %v54_v9, %v54_v9  ;;  %v235_v11 = vld [vmem:[%s447_s2] ss:$0 sm:$0xff]  ;;  %vm183_vm2 = vcmp.lt.s32.totalorder %v182_v20, 32  ;;  %p329_p2 = scmp.ne.s32.totalorder %s218_s23, %s328_s24  ;;  %p334_p4 = scmp.lt.s32.totalorder %s328_s24, %s328_s24 }
  0x2b   :  { %v236_v30 = vld [vmem:[%s448_s3] ss:$0 sm:$0xff] }
  0x2c   :  { %250 = vmatpush3.bf16.msra.mxu0 %v275_v2  ;;  %v237_v32 = vld [vmem:[%s449_s4] ss:$0 sm:$0xff]  ;;  %p335_p5 = por %p334_p4, %p333_p3 }
  0x2d   :  { %251 = vmatprep.subr.bf16.mxu0 %v360_v0 }
  0x2e   :  { %p336_p6 = pnand %p335_p5, %p329_p2 }
  0x30   :  { %252 = vmatpush3.bf16.msra.mxu0 %v276_v3 }
  0x31   :  { %253 = vmatprep.subr.bf16.mxu0 %v360_v0 }
  0x34   :  { %254 = vmatpush3.bf16.msra.mxu0 %v277_v4 }
  0x35   :  { %255 = vmatprep.subr.bf16.mxu0 %v360_v0 }
  0x38   :  { %256 = vmatpush3.bf16.msra.mxu0 %v278_v5 }
  0x39   :  { %257 = vmatprep.subr.bf16.mxu0 %v360_v0 }
  0x3c   :  { %258 = vmatpush3.bf16.msra.mxu0 %v279_v6 }
  0x3d   :  { %259 = vmatprep.subr.bf16.mxu0 %v360_v0 }
  0x40   :  { %260 = vmatpush3.bf16.msra.mxu0 %v280_v7 }
  0x41   :  { %261 = vmatprep.subr.bf16.mxu0 %v360_v0 }
  0x44   :  { %262 = vmatpush3.bf16.msra.mxu0 %v281_v8 }
  0x47   :  { %264 = vmatmul.mubr.bf16.vlgmr.msra.gmra.mrb[0].mxu0 %v55_v10 }
 0x11a   :  { %v154_v12 = vpop.f32.mrb[0].mxu0 }
 0x11b   :  { %v173_v13 = vadd.f32 %v235_v11, %v154_v12  ;;  %v265_v14 = vpop.f32.mrb[1].mxu0 }
 0x11c   :  { %v157_v15 = vpop.f32.mrb[2].mxu0 }
 0x11d   :  { %v266_v16 = vpop.f32.mrb[3].mxu0  ;;  %vm174_vm1 = vcmp.ge.f32.partialorder %v173_v13, 0.0  ;;  %v175_v17 = vmul.f32 0.01, %v173_v13 }
 0x11f   :  { %v176_v18 = vsel %vm174_vm1, %v173_v13, %v175_v17 }
 0x120   :  { %177 = vadd.xlane.f32.xlu0 %v176_v18 }
 0x1ad   :  { %v178_v21 = vpop.xlane.xlu0 %177 }
 0x1ae   :  { %v179_v22 = vmul.f32 0.03125, %v178_v21 }
 0x1b0   :  { %v180_v23 = vsub.f32 %v176_v18, %v179_v22 }
 0x1b2   :  { %v184_v24 = vsel %vm183_vm2, %v180_v23, 0.0 }
 0x1b3   :  { %v185_v25 = vmul.f32 %v184_v24, %v184_v24 }
 0x1b5   :  { %186 = vadd.xlane.f32.xlu0 %v185_v25 }
 0x242   :  { %v187_v26 = vpop.xlane.xlu0 %186 }
 0x243   :  { %v188_v27 = vmul.f32 0.03125, %v187_v26 }
 0x245   :  { %v189_v28 = vadd.f32 1e-05, %v188_v27 }
 0x247   :  { %282 = vrsqrt.f32 %v189_v28 }
 0x251   :  { %v283_v29 = vpop.eup %282 }
 0x252   :  { %v191_v31 = vmul.f32 %v283_v29, %v184_v24 }
 0x254   :  { %v199_v33 = vmul.f32 %v236_v30, %v191_v31 }
 0x256   :  { %v207_v34 = vadd.f32 %v237_v32, %v199_v33 }
 0x258   :  { %v209_v35 = vadd.f32 %v207_v34, %v54_v9 }
 0x25a   :  { %210 = vst [vmem:[#allocation8] sm:$0xff] %v209_v35 }
 0x25b   :  { %339 = shalt.err (!%p336_p6)
}
 0x25c   :  { %s340_s26 = scalar_lea.hbm %s450_s5, 128 }
 0x25d   :  { %p341_p7 = scmp.ne.s32.totalorder %s450_s5, %s340_s26  ;;  %p344_p8 = scmp.lt.u32.totalorder %s340_s26, %s450_s5 }
 0x25f   :  { %p346_p9 = pnand %p344_p8, %p341_p7 }
 0x261   :  { %349 = shalt.err (!%p346_p9)
}
 0x262   :  { %220 = dma.vmem_to_hbm [thread:$0]  %s218_s23, 128, %s450_s5, [#allocation5]  }
 0x263   :  { %354 = dma.done.wait [#allocation5], 128  }
 0x264   :  { %355 = vsyncadd [#allocation5], 4294967168 }
 0x265   :  { %224 = vsyncpa [#allocation4], 1 }
 0x266   :  { %225 = vsyncpa [#allocation7], 1 }
 0x267   :  { %226 = vsyncpa [#allocation5], 1 }

</bundles_post_ra>
